<compile_context>
chip_gen: v6e
topology: v6e:2x2x1
jax: 0.10.0
libtpu: 0.0.40
codegen_flags: <defaults>
</compile_context>

<pallas_src>
import functools
import math

import jax
import jax.numpy as jnp
from jax import lax
from jax.experimental import pallas as pl
from jax.experimental.pallas import tpu as pltpu


def _mhsa_kernel(x_ref,                        # (TB, N, D)
                 wq_ref, wk_ref, wv_ref,       # (H, D, d)  head-major
                 wl_ref,                       # (H, d, D)  head-major
                 bq_ref, bk_ref, bv_ref,       # (H, 1, d)
                 bl_ref,                       # (1, D)
                 o_ref,                        # (TB, N, D)
                 *, head_num, scale):
    f32 = jnp.float32
    tb, n, d_model = x_ref.shape
    d = d_model // head_num
    in_dtype = x_ref.dtype

    # Flatten the batch tile into the MXU M dimension for the projections.
    x2 = x_ref[...].reshape(tb * n, d_model)                        # (TB*N, D)

    out_acc = None
    for h in range(head_num):                                       # static unroll
        # Per-head projections: (TB*N, D) @ (D, d), f32 accumulation.
        qh = jnp.dot(x2, wq_ref[h], preferred_element_type=f32) + bq_ref[h].astype(f32)
        kh = jnp.dot(x2, wk_ref[h], preferred_element_type=f32) + bk_ref[h].astype(f32)
        vh = jnp.dot(x2, wv_ref[h], preferred_element_type=f32) + bv_ref[h].astype(f32)

        # Fold 1/sqrt(d) into Q once; cast MXU operands back to input dtype.
        qh = (qh * scale).astype(in_dtype).reshape(tb, n, d)
        kh = kh.astype(in_dtype).reshape(tb, n, d)
        vh = vh.astype(in_dtype).reshape(tb, n, d)

        # QK^T via contraction dims (no materialized transpose), batched over TB.
        s = lax.dot_general(qh, kh, (((2,), (2,)), ((0,), (0,))),
                            preferred_element_type=f32)             # (TB, N, N) f32

        # Stable softmax: f32 max/sum; normalization deferred to the context.
        m = jnp.max(s, axis=-1, keepdims=True)
        p = jnp.exp(s - m)                                           # (TB, N, N) f32
        rowsum = jnp.sum(p, axis=-1, keepdims=True)                  # (TB, N, 1) f32

        ctx = lax.dot_general(p.astype(in_dtype), vh,
                              (((2,), (1,)), ((0,), (0,))),
                              preferred_element_type=f32)            # (TB, N, d) f32
        ctx = ctx * pl.reciprocal(rowsum, approx=True)               # EUP, ~free

        # Per-head output projection accumulated into the full-width output.
        ctx2 = ctx.astype(in_dtype).reshape(tb * n, d)
        proj = jnp.dot(ctx2, wl_ref[h], preferred_element_type=f32)  # (TB*N, D)
        out_acc = proj if out_acc is None else out_acc + proj

    out = out_acc + bl_ref[...].astype(f32)                          # (+ (1, D) bias)
    o_ref[...] = out.reshape(tb, n, d_model).astype(o_ref.dtype)


def _largest_divisor_leq(n, cap):
    cap = max(1, min(n, cap))
    for c in range(cap, 0, -1):
        if n % c == 0:
            return c
    return 1


def multihead_self_attention(x, wq, bq, wk, bk, wv, bv, wl, bl, *, head_num):
    """x: (B, N, D); w*: (D, D) in `x @ W` convention; b*: (D,)."""
    B, N, D = x.shape
    assert D % head_num == 0
    d = D // head_num
    scale = 1.0 / math.sqrt(d)

    # Head-major weight/bias layout: leading-axis indexing in the kernel
    # instead of lane-dimension slices / concat.
    wq_h = wq.reshape(D, head_num, d).transpose(1, 0, 2)             # (H, D, d)
    wk_h = wk.reshape(D, head_num, d).transpose(1, 0, 2)
    wv_h = wv.reshape(D, head_num, d).transpose(1, 0, 2)
    wl_h = wl.reshape(head_num, d, D)                                # (H, d, D)
    bq_h = bq.reshape(head_num, 1, d)
    bk_h = bk.reshape(head_num, 1, d)
    bv_h = bv.reshape(head_num, 1, d)
    bl_2 = bl.reshape(1, D)

    # Block several batch elements per grid step so the projections present a
    # reasonable MXU M dimension (target ~256 rows) and overhead amortizes.
    TB = _largest_divisor_leq(B, max(1, 256 // max(N, 1)))
    grid = (B // TB,)

    itemsize = x.dtype.itemsize
    est = (4 * D * D * itemsize                      # resident weights
           + (3 * head_num * d + D) * itemsize       # biases
           + 2 * 2 * TB * N * D * itemsize           # double-buffered in/out tiles
           + 3 * TB * N * d * 4                      # per-head q, k, v (f32)
           + 2 * TB * N * N * 4                      # score + prob tiles (f32)
           + TB * N * D * 4)                         # f32 output accumulator
    vmem_limit = int(min(96 * 2**20, max(32 * 2**20, 2 * est)))

    kernel = functools.partial(_mhsa_kernel, head_num=head_num, scale=scale)

    def const(shape):
        return pl.BlockSpec(shape, lambda b: (0,) * len(shape))

    return pl.pallas_call(
        kernel,
        out_shape=jax.ShapeDtypeStruct((B, N, D), x.dtype),
        grid=grid,
        in_specs=[pl.BlockSpec((TB, N, D), lambda b: (b, 0, 0)),
                  const((head_num, D, d)), const((head_num, D, d)),
                  const((head_num, D, d)), const((head_num, d, D)),
                  const((head_num, 1, d)), const((head_num, 1, d)),
                  const((head_num, 1, d)), const((1, D))],
        out_specs=pl.BlockSpec((TB, N, D), lambda b: (b, 0, 0)),
        compiler_params=pltpu.CompilerParams(
            dimension_semantics=("parallel",),       # batch tiles are independent
            vmem_limit_bytes=vmem_limit),
    )(x, wq_h, wk_h, wv_h, wl_h, bq_h, bk_h, bv_h, bl_2)


def _reference(x, wq, bq, wk, bk, wv, bv, wl, bl, head_num):
    B, N, D = x.shape
    d = D // head_num
    q = (x @ wq + bq).reshape(B, N, head_num, d).transpose(0, 2, 1, 3)
    k = (x @ wk + bk).reshape(B, N, head_num, d).transpose(0, 2, 1, 3)
    v = (x @ wv + bv).reshape(B, N, head_num, d).transpose(0, 2, 1, 3)
    s = jnp.einsum("bhqd,bhkd->bhqk", q, k) / jnp.sqrt(jnp.float32(d))
    a = jax.nn.softmax(s, axis=-1)
    ctx = jnp.einsum("bhqk,bhkd->bhqd", a, v)
    ctx = ctx.transpose(0, 2, 1, 3).reshape(B, N, D)
    return ctx @ wl + bl


if __name__ == "__main__":
    key = jax.random.PRNGKey(0)
    ks = jax.random.split(key, 9)

    B, N, D, H = 2, 8, 32, 4          # batch=2, seq=8, input_dim=32, heads=4
    x = jax.random.normal(ks[0], (B, N, D), dtype=jnp.float32)

    wq = jax.random.normal(ks[1], (D, D), dtype=jnp.float32) * 0.05
    wk = jax.random.normal(ks[2], (D, D), dtype=jnp.float32) * 0.05
    wv = jax.random.normal(ks[3], (D, D), dtype=jnp.float32) * 0.05
    wl = jax.random.normal(ks[4], (D, D), dtype=jnp.float32) * 0.05
    bq = jax.random.normal(ks[5], (D,), dtype=jnp.float32) * 0.01
    bk = jax.random.normal(ks[6], (D,), dtype=jnp.float32) * 0.01
    bv = jax.random.normal(ks[7], (D,), dtype=jnp.float32) * 0.01
    bl = jax.random.normal(ks[8], (D,), dtype=jnp.float32) * 0.01

    out = multihead_self_attention(x, wq, bq, wk, bk, wv, bv, wl, bl, head_num=H)
    out = jax.block_until_ready(out)
    assert out.shape == (B, N, D)

    ref = _reference(x, wq, bq, wk, bk, wv, bv, wl, bl, H)
    assert jnp.allclose(out, ref, rtol=2e-2, atol=2e-2), "mismatch vs reference"

    print("KERNEL_OK")
</pallas_src>

<mosaic_0001>
module attributes {stable_mosaic.version = 11 : i64} {
  func.func @_mhsa_kernel(%arg0: i32, %arg1: memref<2x8x32xf32, #tpu.memory_space<vmem>>, %arg2: memref<4x32x8xf32, #tpu.memory_space<vmem>>, %arg3: memref<4x32x8xf32, #tpu.memory_space<vmem>>, %arg4: memref<4x32x8xf32, #tpu.memory_space<vmem>>, %arg5: memref<4x8x32xf32, #tpu.memory_space<vmem>>, %arg6: memref<4x1x8xf32, #tpu.memory_space<vmem>>, %arg7: memref<4x1x8xf32, #tpu.memory_space<vmem>>, %arg8: memref<4x1x8xf32, #tpu.memory_space<vmem>>, %arg9: memref<1x32xf32, #tpu.memory_space<vmem>>, %arg10: memref<2x8x32xf32, #tpu.memory_space<vmem>>) attributes {dimension_semantics = [#tpu.dimension_semantics<parallel>], iteration_bounds = array<i64: 1>, scalar_prefetch = 0 : i64, scratch_operands = 0 : i64, tpu.core_type = #tpu.core_type<tc>, window_params = [{transform_indices = @transform_0, window_bounds = array<i64: 2, 8, 32>}, {pipeline_mode = #tpu.pipeline_mode<synchronous>, transform_indices = @transform_1, window_bounds = array<i64: 4, 32, 8>}, {pipeline_mode = #tpu.pipeline_mode<synchronous>, transform_indices = @transform_2, window_bounds = array<i64: 4, 32, 8>}, {pipeline_mode = #tpu.pipeline_mode<synchronous>, transform_indices = @transform_3, window_bounds = array<i64: 4, 32, 8>}, {pipeline_mode = #tpu.pipeline_mode<synchronous>, transform_indices = @transform_4, window_bounds = array<i64: 4, 8, 32>}, {pipeline_mode = #tpu.pipeline_mode<synchronous>, transform_indices = @transform_5, window_bounds = array<i64: 4, 1, 8>}, {pipeline_mode = #tpu.pipeline_mode<synchronous>, transform_indices = @transform_6, window_bounds = array<i64: 4, 1, 8>}, {pipeline_mode = #tpu.pipeline_mode<synchronous>, transform_indices = @transform_7, window_bounds = array<i64: 4, 1, 8>}, {pipeline_mode = #tpu.pipeline_mode<synchronous>, transform_indices = @transform_8, window_bounds = array<i64: 1, 32>}, {transform_indices = @transform_9, window_bounds = array<i64: 2, 8, 32>}]} {
    %c0 = arith.constant 0 : index
    %c0_0 = arith.constant 0 : index
    %c0_1 = arith.constant 0 : index
    %0 = vector.load %arg1[%c0, %c0_0, %c0_1] : memref<2x8x32xf32, #tpu.memory_space<vmem>>, vector<2x8x32xf32>
    %1 = vector.shape_cast %0 : vector<2x8x32xf32> to vector<16x32xf32>
    %c0_2 = arith.constant 0 : index
    %c0_3 = arith.constant 0 : index
    %c0_4 = arith.constant 0 : index
    %2 = vector.load %arg2[%c0_2, %c0_3, %c0_4] : memref<4x32x8xf32, #tpu.memory_space<vmem>>, vector<1x32x8xf32>
    %3 = vector.shape_cast %2 : vector<1x32x8xf32> to vector<32x8xf32>
    %cst = arith.constant dense<0.000000e+00> : vector<16x8xf32>
    %4 = tpu.matmul %1, %3, %cst {dimension_numbers = #tpu.dot_dimension_numbers<[1], [0], [0], [1], [0, 0, 1, 1], [], []>} : vector<16x32xf32>, vector<32x8xf32>, vector<16x8xf32> -> vector<16x8xf32>
    %c0_5 = arith.constant 0 : index
    %c0_6 = arith.constant 0 : index
    %c0_7 = arith.constant 0 : index
    %5 = vector.load %arg6[%c0_5, %c0_6, %c0_7] : memref<4x1x8xf32, #tpu.memory_space<vmem>>, vector<1x1x8xf32>
    %6 = vector.shape_cast %5 : vector<1x1x8xf32> to vector<1x8xf32>
    %7 = vector.broadcast %6 : vector<1x8xf32> to vector<16x8xf32>
    %8 = arith.addf %4, %7 : vector<16x8xf32>
    %c0_8 = arith.constant 0 : index
    %c0_9 = arith.constant 0 : index
    %c0_10 = arith.constant 0 : index
    %9 = vector.load %arg3[%c0_8, %c0_9, %c0_10] : memref<4x32x8xf32, #tpu.memory_space<vmem>>, vector<1x32x8xf32>
    %10 = vector.shape_cast %9 : vector<1x32x8xf32> to vector<32x8xf32>
    %cst_11 = arith.constant dense<0.000000e+00> : vector<16x8xf32>
    %11 = tpu.matmul %1, %10, %cst_11 {dimension_numbers = #tpu.dot_dimension_numbers<[1], [0], [0], [1], [0, 0, 1, 1], [], []>} : vector<16x32xf32>, vector<32x8xf32>, vector<16x8xf32> -> vector<16x8xf32>
    %c0_12 = arith.constant 0 : index
    %c0_13 = arith.constant 0 : index
    %c0_14 = arith.constant 0 : index
    %12 = vector.load %arg7[%c0_12, %c0_13, %c0_14] : memref<4x1x8xf32, #tpu.memory_space<vmem>>, vector<1x1x8xf32>
    %13 = vector.shape_cast %12 : vector<1x1x8xf32> to vector<1x8xf32>
    %14 = vector.broadcast %13 : vector<1x8xf32> to vector<16x8xf32>
    %15 = arith.addf %11, %14 : vector<16x8xf32>
    %c0_15 = arith.constant 0 : index
    %c0_16 = arith.constant 0 : index
    %c0_17 = arith.constant 0 : index
    %16 = vector.load %arg4[%c0_15, %c0_16, %c0_17] : memref<4x32x8xf32, #tpu.memory_space<vmem>>, vector<1x32x8xf32>
    %17 = vector.shape_cast %16 : vector<1x32x8xf32> to vector<32x8xf32>
    %cst_18 = arith.constant dense<0.000000e+00> : vector<16x8xf32>
    %18 = tpu.matmul %1, %17, %cst_18 {dimension_numbers = #tpu.dot_dimension_numbers<[1], [0], [0], [1], [0, 0, 1, 1], [], []>} : vector<16x32xf32>, vector<32x8xf32>, vector<16x8xf32> -> vector<16x8xf32>
    %c0_19 = arith.constant 0 : index
    %c0_20 = arith.constant 0 : index
    %c0_21 = arith.constant 0 : index
    %19 = vector.load %arg8[%c0_19, %c0_20, %c0_21] : memref<4x1x8xf32, #tpu.memory_space<vmem>>, vector<1x1x8xf32>
    %20 = vector.shape_cast %19 : vector<1x1x8xf32> to vector<1x8xf32>
    %21 = vector.broadcast %20 : vector<1x8xf32> to vector<16x8xf32>
    %22 = arith.addf %18, %21 : vector<16x8xf32>
    %cst_22 = arith.constant 0.353553385 : f32
    %23 = vector.broadcast %cst_22 : f32 to vector<16x8xf32>
    %24 = arith.mulf %8, %23 : vector<16x8xf32>
    %25 = vector.shape_cast %24 : vector<16x8xf32> to vector<2x8x8xf32>
    %26 = vector.shape_cast %15 : vector<16x8xf32> to vector<2x8x8xf32>
    %27 = vector.shape_cast %22 : vector<16x8xf32> to vector<2x8x8xf32>
    %cst_23 = arith.constant dense<0.000000e+00> : vector<2x8x8xf32>
    %28 = tpu.matmul %25, %26, %cst_23 {dimension_numbers = #tpu.dot_dimension_numbers<[2], [2], [1], [1], [0, 0, 0, 1, 1, 1], [0], [0]>} : vector<2x8x8xf32>, vector<2x8x8xf32>, vector<2x8x8xf32> -> vector<2x8x8xf32>
    %cst_24 = arith.constant dense<0xFF800000> : vector<2x8xf32>
    %29 = vector.multi_reduction <maximumf>, %28, %cst_24 [2] : vector<2x8x8xf32> to vector<2x8xf32>
    %30 = vector.shape_cast %29 : vector<2x8xf32> to vector<2x8x1xf32>
    %31 = vector.broadcast %30 : vector<2x8x1xf32> to vector<2x8x8xf32>
    %32 = arith.subf %28, %31 : vector<2x8x8xf32>
    %33 = math.exp %32 : vector<2x8x8xf32>
    %cst_25 = arith.constant dense<0.000000e+00> : vector<2x8xf32>
    %34 = vector.multi_reduction <add>, %33, %cst_25 [2] : vector<2x8x8xf32> to vector<2x8xf32>
    %35 = vector.shape_cast %34 : vector<2x8xf32> to vector<2x8x1xf32>
    %cst_26 = arith.constant dense<0.000000e+00> : vector<2x8x8xf32>
    %36 = tpu.matmul %33, %27, %cst_26 {dimension_numbers = #tpu.dot_dimension_numbers<[2], [1], [1], [2], [0, 0, 0, 1, 1, 2], [0], [0]>} : vector<2x8x8xf32>, vector<2x8x8xf32>, vector<2x8x8xf32> -> vector<2x8x8xf32>
    %37 = tpu.reciprocal %35 {approx = true} : vector<2x8x1xf32> -> vector<2x8x1xf32>
    %38 = vector.broadcast %37 : vector<2x8x1xf32> to vector<2x8x8xf32>
    %39 = arith.mulf %36, %38 : vector<2x8x8xf32>
    %40 = vector.shape_cast %39 : vector<2x8x8xf32> to vector<16x8xf32>
    %c0_27 = arith.constant 0 : index
    %c0_28 = arith.constant 0 : index
    %c0_29 = arith.constant 0 : index
    %41 = vector.load %arg5[%c0_27, %c0_28, %c0_29] : memref<4x8x32xf32, #tpu.memory_space<vmem>>, vector<1x8x32xf32>
    %42 = vector.shape_cast %41 : vector<1x8x32xf32> to vector<8x32xf32>
    %cst_30 = arith.constant dense<0.000000e+00> : vector<16x32xf32>
    %43 = tpu.matmul %40, %42, %cst_30 {dimension_numbers = #tpu.dot_dimension_numbers<[1], [0], [0], [1], [0, 0, 1, 1], [], []>} : vector<16x8xf32>, vector<8x32xf32>, vector<16x32xf32> -> vector<16x32xf32>
    %c1 = arith.constant 1 : index
    %c0_31 = arith.constant 0 : index
    %c0_32 = arith.constant 0 : index
    %44 = vector.load %arg2[%c1, %c0_31, %c0_32] : memref<4x32x8xf32, #tpu.memory_space<vmem>>, vector<1x32x8xf32>
    %45 = vector.shape_cast %44 : vector<1x32x8xf32> to vector<32x8xf32>
    %cst_33 = arith.constant dense<0.000000e+00> : vector<16x8xf32>
    %46 = tpu.matmul %1, %45, %cst_33 {dimension_numbers = #tpu.dot_dimension_numbers<[1], [0], [0], [1], [0, 0, 1, 1], [], []>} : vector<16x32xf32>, vector<32x8xf32>, vector<16x8xf32> -> vector<16x8xf32>
    %c1_34 = arith.constant 1 : index
    %c0_35 = arith.constant 0 : index
    %c0_36 = arith.constant 0 : index
    %47 = vector.load %arg6[%c1_34, %c0_35, %c0_36] : memref<4x1x8xf32, #tpu.memory_space<vmem>>, vector<1x1x8xf32>
    %48 = vector.shape_cast %47 : vector<1x1x8xf32> to vector<1x8xf32>
    %49 = vector.broadcast %48 : vector<1x8xf32> to vector<16x8xf32>
    %50 = arith.addf %46, %49 : vector<16x8xf32>
    %c1_37 = arith.constant 1 : index
    %c0_38 = arith.constant 0 : index
    %c0_39 = arith.constant 0 : index
    %51 = vector.load %arg3[%c1_37, %c0_38, %c0_39] : memref<4x32x8xf32, #tpu.memory_space<vmem>>, vector<1x32x8xf32>
    %52 = vector.shape_cast %51 : vector<1x32x8xf32> to vector<32x8xf32>
    %cst_40 = arith.constant dense<0.000000e+00> : vector<16x8xf32>
    %53 = tpu.matmul %1, %52, %cst_40 {dimension_numbers = #tpu.dot_dimension_numbers<[1], [0], [0], [1], [0, 0, 1, 1], [], []>} : vector<16x32xf32>, vector<32x8xf32>, vector<16x8xf32> -> vector<16x8xf32>
    %c1_41 = arith.constant 1 : index
    %c0_42 = arith.constant 0 : index
    %c0_43 = arith.constant 0 : index
    %54 = vector.load %arg7[%c1_41, %c0_42, %c0_43] : memref<4x1x8xf32, #tpu.memory_space<vmem>>, vector<1x1x8xf32>
    %55 = vector.shape_cast %54 : vector<1x1x8xf32> to vector<1x8xf32>
    %56 = vector.broadcast %55 : vector<1x8xf32> to vector<16x8xf32>
    %57 = arith.addf %53, %56 : vector<16x8xf32>
    %c1_44 = arith.constant 1 : index
    %c0_45 = arith.constant 0 : index
    %c0_46 = arith.constant 0 : index
    %58 = vector.load %arg4[%c1_44, %c0_45, %c0_46] : memref<4x32x8xf32, #tpu.memory_space<vmem>>, vector<1x32x8xf32>
    %59 = vector.shape_cast %58 : vector<1x32x8xf32> to vector<32x8xf32>
    %cst_47 = arith.constant dense<0.000000e+00> : vector<16x8xf32>
    %60 = tpu.matmul %1, %59, %cst_47 {dimension_numbers = #tpu.dot_dimension_numbers<[1], [0], [0], [1], [0, 0, 1, 1], [], []>} : vector<16x32xf32>, vector<32x8xf32>, vector<16x8xf32> -> vector<16x8xf32>
    %c1_48 = arith.constant 1 : index
    %c0_49 = arith.constant 0 : index
    %c0_50 = arith.constant 0 : index
    %61 = vector.load %arg8[%c1_48, %c0_49, %c0_50] : memref<4x1x8xf32, #tpu.memory_space<vmem>>, vector<1x1x8xf32>
    %62 = vector.shape_cast %61 : vector<1x1x8xf32> to vector<1x8xf32>
    %63 = vector.broadcast %62 : vector<1x8xf32> to vector<16x8xf32>
    %64 = arith.addf %60, %63 : vector<16x8xf32>
    %cst_51 = arith.constant 0.353553385 : f32
    %65 = vector.broadcast %cst_51 : f32 to vector<16x8xf32>
    %66 = arith.mulf %50, %65 : vector<16x8xf32>
    %67 = vector.shape_cast %66 : vector<16x8xf32> to vector<2x8x8xf32>
    %68 = vector.shape_cast %57 : vector<16x8xf32> to vector<2x8x8xf32>
    %69 = vector.shape_cast %64 : vector<16x8xf32> to vector<2x8x8xf32>
    %cst_52 = arith.constant dense<0.000000e+00> : vector<2x8x8xf32>
    %70 = tpu.matmul %67, %68, %cst_52 {dimension_numbers = #tpu.dot_dimension_numbers<[2], [2], [1], [1], [0, 0, 0, 1, 1, 1], [0], [0]>} : vector<2x8x8xf32>, vector<2x8x8xf32>, vector<2x8x8xf32> -> vector<2x8x8xf32>
    %cst_53 = arith.constant dense<0xFF800000> : vector<2x8xf32>
    %71 = vector.multi_reduction <maximumf>, %70, %cst_53 [2] : vector<2x8x8xf32> to vector<2x8xf32>
    %72 = vector.shape_cast %71 : vector<2x8xf32> to vector<2x8x1xf32>
    %73 = vector.broadcast %72 : vector<2x8x1xf32> to vector<2x8x8xf32>
    %74 = arith.subf %70, %73 : vector<2x8x8xf32>
    %75 = math.exp %74 : vector<2x8x8xf32>
    %cst_54 = arith.constant dense<0.000000e+00> : vector<2x8xf32>
    %76 = vector.multi_reduction <add>, %75, %cst_54 [2] : vector<2x8x8xf32> to vector<2x8xf32>
    %77 = vector.shape_cast %76 : vector<2x8xf32> to vector<2x8x1xf32>
    %cst_55 = arith.constant dense<0.000000e+00> : vector<2x8x8xf32>
    %78 = tpu.matmul %75, %69, %cst_55 {dimension_numbers = #tpu.dot_dimension_numbers<[2], [1], [1], [2], [0, 0, 0, 1, 1, 2], [0], [0]>} : vector<2x8x8xf32>, vector<2x8x8xf32>, vector<2x8x8xf32> -> vector<2x8x8xf32>
    %79 = tpu.reciprocal %77 {approx = true} : vector<2x8x1xf32> -> vector<2x8x1xf32>
    %80 = vector.broadcast %79 : vector<2x8x1xf32> to vector<2x8x8xf32>
    %81 = arith.mulf %78, %80 : vector<2x8x8xf32>
    %82 = vector.shape_cast %81 : vector<2x8x8xf32> to vector<16x8xf32>
    %c1_56 = arith.constant 1 : index
    %c0_57 = arith.constant 0 : index
    %c0_58 = arith.constant 0 : index
    %83 = vector.load %arg5[%c1_56, %c0_57, %c0_58] : memref<4x8x32xf32, #tpu.memory_space<vmem>>, vector<1x8x32xf32>
    %84 = vector.shape_cast %83 : vector<1x8x32xf32> to vector<8x32xf32>
    %cst_59 = arith.constant dense<0.000000e+00> : vector<16x32xf32>
    %85 = tpu.matmul %82, %84, %cst_59 {dimension_numbers = #tpu.dot_dimension_numbers<[1], [0], [0], [1], [0, 0, 1, 1], [], []>} : vector<16x8xf32>, vector<8x32xf32>, vector<16x32xf32> -> vector<16x32xf32>
    %86 = arith.addf %43, %85 : vector<16x32xf32>
    %c2 = arith.constant 2 : index
    %c0_60 = arith.constant 0 : index
    %c0_61 = arith.constant 0 : index
    %87 = vector.load %arg2[%c2, %c0_60, %c0_61] : memref<4x32x8xf32, #tpu.memory_space<vmem>>, vector<1x32x8xf32>
    %88 = vector.shape_cast %87 : vector<1x32x8xf32> to vector<32x8xf32>
    %cst_62 = arith.constant dense<0.000000e+00> : vector<16x8xf32>
    %89 = tpu.matmul %1, %88, %cst_62 {dimension_numbers = #tpu.dot_dimension_numbers<[1], [0], [0], [1], [0, 0, 1, 1], [], []>} : vector<16x32xf32>, vector<32x8xf32>, vector<16x8xf32> -> vector<16x8xf32>
    %c2_63 = arith.constant 2 : index
    %c0_64 = arith.constant 0 : index
    %c0_65 = arith.constant 0 : index
    %90 = vector.load %arg6[%c2_63, %c0_64, %c0_65] : memref<4x1x8xf32, #tpu.memory_space<vmem>>, vector<1x1x8xf32>
    %91 = vector.shape_cast %90 : vector<1x1x8xf32> to vector<1x8xf32>
    %92 = vector.broadcast %91 : vector<1x8xf32> to vector<16x8xf32>
    %93 = arith.addf %89, %92 : vector<16x8xf32>
    %c2_66 = arith.constant 2 : index
    %c0_67 = arith.constant 0 : index
    %c0_68 = arith.constant 0 : index
    %94 = vector.load %arg3[%c2_66, %c0_67, %c0_68] : memref<4x32x8xf32, #tpu.memory_space<vmem>>, vector<1x32x8xf32>
    %95 = vector.shape_cast %94 : vector<1x32x8xf32> to vector<32x8xf32>
    %cst_69 = arith.constant dense<0.000000e+00> : vector<16x8xf32>
    %96 = tpu.matmul %1, %95, %cst_69 {dimension_numbers = #tpu.dot_dimension_numbers<[1], [0], [0], [1], [0, 0, 1, 1], [], []>} : vector<16x32xf32>, vector<32x8xf32>, vector<16x8xf32> -> vector<16x8xf32>
    %c2_70 = arith.constant 2 : index
    %c0_71 = arith.constant 0 : index
    %c0_72 = arith.constant 0 : index
    %97 = vector.load %arg7[%c2_70, %c0_71, %c0_72] : memref<4x1x8xf32, #tpu.memory_space<vmem>>, vector<1x1x8xf32>
    %98 = vector.shape_cast %97 : vector<1x1x8xf32> to vector<1x8xf32>
    %99 = vector.broadcast %98 : vector<1x8xf32> to vector<16x8xf32>
    %100 = arith.addf %96, %99 : vector<16x8xf32>
    %c2_73 = arith.constant 2 : index
    %c0_74 = arith.constant 0 : index
    %c0_75 = arith.constant 0 : index
    %101 = vector.load %arg4[%c2_73, %c0_74, %c0_75] : memref<4x32x8xf32, #tpu.memory_space<vmem>>, vector<1x32x8xf32>
    %102 = vector.shape_cast %101 : vector<1x32x8xf32> to vector<32x8xf32>
    %cst_76 = arith.constant dense<0.000000e+00> : vector<16x8xf32>
    %103 = tpu.matmul %1, %102, %cst_76 {dimension_numbers = #tpu.dot_dimension_numbers<[1], [0], [0], [1], [0, 0, 1, 1], [], []>} : vector<16x32xf32>, vector<32x8xf32>, vector<16x8xf32> -> vector<16x8xf32>
    %c2_77 = arith.constant 2 : index
    %c0_78 = arith.constant 0 : index
    %c0_79 = arith.constant 0 : index
    %104 = vector.load %arg8[%c2_77, %c0_78, %c0_79] : memref<4x1x8xf32, #tpu.memory_space<vmem>>, vector<1x1x8xf32>
    %105 = vector.shape_cast %104 : vector<1x1x8xf32> to vector<1x8xf32>
    %106 = vector.broadcast %105 : vector<1x8xf32> to vector<16x8xf32>
    %107 = arith.addf %103, %106 : vector<16x8xf32>
    %cst_80 = arith.constant 0.353553385 : f32
    %108 = vector.broadcast %cst_80 : f32 to vector<16x8xf32>
    %109 = arith.mulf %93, %108 : vector<16x8xf32>
    %110 = vector.shape_cast %109 : vector<16x8xf32> to vector<2x8x8xf32>
    %111 = vector.shape_cast %100 : vector<16x8xf32> to vector<2x8x8xf32>
    %112 = vector.shape_cast %107 : vector<16x8xf32> to vector<2x8x8xf32>
    %cst_81 = arith.constant dense<0.000000e+00> : vector<2x8x8xf32>
    %113 = tpu.matmul %110, %111, %cst_81 {dimension_numbers = #tpu.dot_dimension_numbers<[2], [2], [1], [1], [0, 0, 0, 1, 1, 1], [0], [0]>} : vector<2x8x8xf32>, vector<2x8x8xf32>, vector<2x8x8xf32> -> vector<2x8x8xf32>
    %cst_82 = arith.constant dense<0xFF800000> : vector<2x8xf32>
    %114 = vector.multi_reduction <maximumf>, %113, %cst_82 [2] : vector<2x8x8xf32> to vector<2x8xf32>
    %115 = vector.shape_cast %114 : vector<2x8xf32> to vector<2x8x1xf32>
    %116 = vector.broadcast %115 : vector<2x8x1xf32> to vector<2x8x8xf32>
    %117 = arith.subf %113, %116 : vector<2x8x8xf32>
    %118 = math.exp %117 : vector<2x8x8xf32>
    %cst_83 = arith.constant dense<0.000000e+00> : vector<2x8xf32>
    %119 = vector.multi_reduction <add>, %118, %cst_83 [2] : vector<2x8x8xf32> to vector<2x8xf32>
    %120 = vector.shape_cast %119 : vector<2x8xf32> to vector<2x8x1xf32>
    %cst_84 = arith.constant dense<0.000000e+00> : vector<2x8x8xf32>
    %121 = tpu.matmul %118, %112, %cst_84 {dimension_numbers = #tpu.dot_dimension_numbers<[2], [1], [1], [2], [0, 0, 0, 1, 1, 2], [0], [0]>} : vector<2x8x8xf32>, vector<2x8x8xf32>, vector<2x8x8xf32> -> vector<2x8x8xf32>
    %122 = tpu.reciprocal %120 {approx = true} : vector<2x8x1xf32> -> vector<2x8x1xf32>
    %123 = vector.broadcast %122 : vector<2x8x1xf32> to vector<2x8x8xf32>
    %124 = arith.mulf %121, %123 : vector<2x8x8xf32>
    %125 = vector.shape_cast %124 : vector<2x8x8xf32> to vector<16x8xf32>
    %c2_85 = arith.constant 2 : index
    %c0_86 = arith.constant 0 : index
    %c0_87 = arith.constant 0 : index
    %126 = vector.load %arg5[%c2_85, %c0_86, %c0_87] : memref<4x8x32xf32, #tpu.memory_space<vmem>>, vector<1x8x32xf32>
    %127 = vector.shape_cast %126 : vector<1x8x32xf32> to vector<8x32xf32>
    %cst_88 = arith.constant dense<0.000000e+00> : vector<16x32xf32>
    %128 = tpu.matmul %125, %127, %cst_88 {dimension_numbers = #tpu.dot_dimension_numbers<[1], [0], [0], [1], [0, 0, 1, 1], [], []>} : vector<16x8xf32>, vector<8x32xf32>, vector<16x32xf32> -> vector<16x32xf32>
    %129 = arith.addf %86, %128 : vector<16x32xf32>
    %c3 = arith.constant 3 : index
    %c0_89 = arith.constant 0 : index
    %c0_90 = arith.constant 0 : index
    %130 = vector.load %arg2[%c3, %c0_89, %c0_90] : memref<4x32x8xf32, #tpu.memory_space<vmem>>, vector<1x32x8xf32>
    %131 = vector.shape_cast %130 : vector<1x32x8xf32> to vector<32x8xf32>
    %cst_91 = arith.constant dense<0.000000e+00> : vector<16x8xf32>
    %132 = tpu.matmul %1, %131, %cst_91 {dimension_numbers = #tpu.dot_dimension_numbers<[1], [0], [0], [1], [0, 0, 1, 1], [], []>} : vector<16x32xf32>, vector<32x8xf32>, vector<16x8xf32> -> vector<16x8xf32>
    %c3_92 = arith.constant 3 : index
    %c0_93 = arith.constant 0 : index
    %c0_94 = arith.constant 0 : index
    %133 = vector.load %arg6[%c3_92, %c0_93, %c0_94] : memref<4x1x8xf32, #tpu.memory_space<vmem>>, vector<1x1x8xf32>
    %134 = vector.shape_cast %133 : vector<1x1x8xf32> to vector<1x8xf32>
    %135 = vector.broadcast %134 : vector<1x8xf32> to vector<16x8xf32>
    %136 = arith.addf %132, %135 : vector<16x8xf32>
    %c3_95 = arith.constant 3 : index
    %c0_96 = arith.constant 0 : index
    %c0_97 = arith.constant 0 : index
    %137 = vector.load %arg3[%c3_95, %c0_96, %c0_97] : memref<4x32x8xf32, #tpu.memory_space<vmem>>, vector<1x32x8xf32>
    %138 = vector.shape_cast %137 : vector<1x32x8xf32> to vector<32x8xf32>
    %cst_98 = arith.constant dense<0.000000e+00> : vector<16x8xf32>
    %139 = tpu.matmul %1, %138, %cst_98 {dimension_numbers = #tpu.dot_dimension_numbers<[1], [0], [0], [1], [0, 0, 1, 1], [], []>} : vector<16x32xf32>, vector<32x8xf32>, vector<16x8xf32> -> vector<16x8xf32>
    %c3_99 = arith.constant 3 : index
    %c0_100 = arith.constant 0 : index
    %c0_101 = arith.constant 0 : index
    %140 = vector.load %arg7[%c3_99, %c0_100, %c0_101] : memref<4x1x8xf32, #tpu.memory_space<vmem>>, vector<1x1x8xf32>
    %141 = vector.shape_cast %140 : vector<1x1x8xf32> to vector<1x8xf32>
    %142 = vector.broadcast %141 : vector<1x8xf32> to vector<16x8xf32>
    %143 = arith.addf %139, %142 : vector<16x8xf32>
    %c3_102 = arith.constant 3 : index
    %c0_103 = arith.constant 0 : index
    %c0_104 = arith.constant 0 : index
    %144 = vector.load %arg4[%c3_102, %c0_103, %c0_104] : memref<4x32x8xf32, #tpu.memory_space<vmem>>, vector<1x32x8xf32>
    %145 = vector.shape_cast %144 : vector<1x32x8xf32> to vector<32x8xf32>
    %cst_105 = arith.constant dense<0.000000e+00> : vector<16x8xf32>
    %146 = tpu.matmul %1, %145, %cst_105 {dimension_numbers = #tpu.dot_dimension_numbers<[1], [0], [0], [1], [0, 0, 1, 1], [], []>} : vector<16x32xf32>, vector<32x8xf32>, vector<16x8xf32> -> vector<16x8xf32>
    %c3_106 = arith.constant 3 : index
    %c0_107 = arith.constant 0 : index
    %c0_108 = arith.constant 0 : index
    %147 = vector.load %arg8[%c3_106, %c0_107, %c0_108] : memref<4x1x8xf32, #tpu.memory_space<vmem>>, vector<1x1x8xf32>
    %148 = vector.shape_cast %147 : vector<1x1x8xf32> to vector<1x8xf32>
    %149 = vector.broadcast %148 : vector<1x8xf32> to vector<16x8xf32>
    %150 = arith.addf %146, %149 : vector<16x8xf32>
    %cst_109 = arith.constant 0.353553385 : f32
    %151 = vector.broadcast %cst_109 : f32 to vector<16x8xf32>
    %152 = arith.mulf %136, %151 : vector<16x8xf32>
    %153 = vector.shape_cast %152 : vector<16x8xf32> to vector<2x8x8xf32>
    %154 = vector.shape_cast %143 : vector<16x8xf32> to vector<2x8x8xf32>
    %155 = vector.shape_cast %150 : vector<16x8xf32> to vector<2x8x8xf32>
    %cst_110 = arith.constant dense<0.000000e+00> : vector<2x8x8xf32>
    %156 = tpu.matmul %153, %154, %cst_110 {dimension_numbers = #tpu.dot_dimension_numbers<[2], [2], [1], [1], [0, 0, 0, 1, 1, 1], [0], [0]>} : vector<2x8x8xf32>, vector<2x8x8xf32>, vector<2x8x8xf32> -> vector<2x8x8xf32>
    %cst_111 = arith.constant dense<0xFF800000> : vector<2x8xf32>
    %157 = vector.multi_reduction <maximumf>, %156, %cst_111 [2] : vector<2x8x8xf32> to vector<2x8xf32>
    %158 = vector.shape_cast %157 : vector<2x8xf32> to vector<2x8x1xf32>
    %159 = vector.broadcast %158 : vector<2x8x1xf32> to vector<2x8x8xf32>
    %160 = arith.subf %156, %159 : vector<2x8x8xf32>
    %161 = math.exp %160 : vector<2x8x8xf32>
    %cst_112 = arith.constant dense<0.000000e+00> : vector<2x8xf32>
    %162 = vector.multi_reduction <add>, %161, %cst_112 [2] : vector<2x8x8xf32> to vector<2x8xf32>
    %163 = vector.shape_cast %162 : vector<2x8xf32> to vector<2x8x1xf32>
    %cst_113 = arith.constant dense<0.000000e+00> : vector<2x8x8xf32>
    %164 = tpu.matmul %161, %155, %cst_113 {dimension_numbers = #tpu.dot_dimension_numbers<[2], [1], [1], [2], [0, 0, 0, 1, 1, 2], [0], [0]>} : vector<2x8x8xf32>, vector<2x8x8xf32>, vector<2x8x8xf32> -> vector<2x8x8xf32>
    %165 = tpu.reciprocal %163 {approx = true} : vector<2x8x1xf32> -> vector<2x8x1xf32>
    %166 = vector.broadcast %165 : vector<2x8x1xf32> to vector<2x8x8xf32>
    %167 = arith.mulf %164, %166 : vector<2x8x8xf32>
    %168 = vector.shape_cast %167 : vector<2x8x8xf32> to vector<16x8xf32>
    %c3_114 = arith.constant 3 : index
    %c0_115 = arith.constant 0 : index
    %c0_116 = arith.constant 0 : index
    %169 = vector.load %arg5[%c3_114, %c0_115, %c0_116] : memref<4x8x32xf32, #tpu.memory_space<vmem>>, vector<1x8x32xf32>
    %170 = vector.shape_cast %169 : vector<1x8x32xf32> to vector<8x32xf32>
    %cst_117 = arith.constant dense<0.000000e+00> : vector<16x32xf32>
    %171 = tpu.matmul %168, %170, %cst_117 {dimension_numbers = #tpu.dot_dimension_numbers<[1], [0], [0], [1], [0, 0, 1, 1], [], []>} : vector<16x8xf32>, vector<8x32xf32>, vector<16x32xf32> -> vector<16x32xf32>
    %172 = arith.addf %129, %171 : vector<16x32xf32>
    %c0_118 = arith.constant 0 : index
    %c0_119 = arith.constant 0 : index
    %173 = vector.load %arg9[%c0_118, %c0_119] : memref<1x32xf32, #tpu.memory_space<vmem>>, vector<1x32xf32>
    %174 = vector.broadcast %173 : vector<1x32xf32> to vector<16x32xf32>
    %175 = arith.addf %172, %174 : vector<16x32xf32>
    %176 = vector.shape_cast %175 : vector<16x32xf32> to vector<2x8x32xf32>
    %c0_120 = arith.constant 0 : index
    %c0_121 = arith.constant 0 : index
    %c0_122 = arith.constant 0 : index
    %177 = vector.load %arg10[%c0_120, %c0_121, %c0_122] : memref<2x8x32xf32, #tpu.memory_space<vmem>>, vector<2x8x32xf32>
    tpu.vector_store %arg10[%c0_120, %c0_121, %c0_122], %176 {strides = array<i32>} : memref<2x8x32xf32, #tpu.memory_space<vmem>>, vector<2x8x32xf32>,
    return
  }
  func.func @transform_0(%arg0: i32) -> (i32, i32, i32) {
    %c0_i32 = arith.constant 0 : i32
    %c0_i32_0 = arith.constant 0 : i32
    %c0_i32_1 = arith.constant 0 : i32
    return %arg0, %c0_i32, %c0_i32_0 : i32, i32, i32
  }
  func.func @transform_1(%arg0: i32) -> (i32, i32, i32) {
    %c0_i32 = arith.constant 0 : i32
    %c0_i32_0 = arith.constant 0 : i32
    %c0_i32_1 = arith.constant 0 : i32
    %c0_i32_2 = arith.constant 0 : i32
    return %c0_i32, %c0_i32_0, %c0_i32_1 : i32, i32, i32
  }
  func.func @transform_2(%arg0: i32) -> (i32, i32, i32) {
    %c0_i32 = arith.constant 0 : i32
    %c0_i32_0 = arith.constant 0 : i32
    %c0_i32_1 = arith.constant 0 : i32
    %c0_i32_2 = arith.constant 0 : i32
    return %c0_i32, %c0_i32_0, %c0_i32_1 : i32, i32, i32
  }
  func.func @transform_3(%arg0: i32) -> (i32, i32, i32) {
    %c0_i32 = arith.constant 0 : i32
    %c0_i32_0 = arith.constant 0 : i32
    %c0_i32_1 = arith.constant 0 : i32
    %c0_i32_2 = arith.constant 0 : i32
    return %c0_i32, %c0_i32_0, %c0_i32_1 : i32, i32, i32
  }
  func.func @transform_4(%arg0: i32) -> (i32, i32, i32) {
    %c0_i32 = arith.constant 0 : i32
    %c0_i32_0 = arith.constant 0 : i32
    %c0_i32_1 = arith.constant 0 : i32
    %c0_i32_2 = arith.constant 0 : i32
    return %c0_i32, %c0_i32_0, %c0_i32_1 : i32, i32, i32
  }
  func.func @transform_5(%arg0: i32) -> (i32, i32, i32) {
    %c0_i32 = arith.constant 0 : i32
    %c0_i32_0 = arith.constant 0 : i32
    %c0_i32_1 = arith.constant 0 : i32
    %c0_i32_2 = arith.constant 0 : i32
    return %c0_i32, %c0_i32_0, %c0_i32_1 : i32, i32, i32
  }
  func.func @transform_6(%arg0: i32) -> (i32, i32, i32) {
    %c0_i32 = arith.constant 0 : i32
    %c0_i32_0 = arith.constant 0 : i32
    %c0_i32_1 = arith.constant 0 : i32
    %c0_i32_2 = arith.constant 0 : i32
    return %c0_i32, %c0_i32_0, %c0_i32_1 : i32, i32, i32
  }
  func.func @transform_7(%arg0: i32) -> (i32, i32, i32) {
    %c0_i32 = arith.constant 0 : i32
    %c0_i32_0 = arith.constant 0 : i32
    %c0_i32_1 = arith.constant 0 : i32
    %c0_i32_2 = arith.constant 0 : i32
    return %c0_i32, %c0_i32_0, %c0_i32_1 : i32, i32, i32
  }
  func.func @transform_8(%arg0: i32) -> (i32, i32) {
    %c0_i32 = arith.constant 0 : i32
    %c0_i32_0 = arith.constant 0 : i32
    %c0_i32_1 = arith.constant 0 : i32
    return %c0_i32, %c0_i32_0 : i32, i32
  }
  func.func @transform_9(%arg0: i32) -> (i32, i32, i32) {
    %c0_i32 = arith.constant 0 : i32
    %c0_i32_0 = arith.constant 0 : i32
    %c0_i32_1 = arith.constant 0 : i32
    return %arg0, %c0_i32, %c0_i32_0 : i32, i32, i32
  }
}

</mosaic_0001>

<bundles_post_ra>
// kernel: tpu_custom_call.1
= control target key start
LH: loop header
LB: loop body
LE: loop exit
PB: predicated region body
PF: predicated region fallthrough
CT: control target
= control target key end

     0   :  { %s3701_s0 = inlined_call_operand.vmem [shape: f32[2,8,32], index: 0, kind: input, shape index: {}]   ;;  %s3702_s1 = inlined_call_operand.vmem [shape: f32[4,32,8], index: 1, kind: input, shape index: {}]   ;;  %s3703_s2 = inlined_call_operand.vmem [shape: f32[4,32,8], index: 2, kind: input, shape index: {}]   ;;  %s3704_s3 = inlined_call_operand.vmem [shape: f32[4,32,8], index: 3, kind: input, shape index: {}]   ;;  %s3705_s4 = inlined_call_operand.vmem [shape: f32[4,8,32], index: 4, kind: input, shape index: {}]   ;;  %s3706_s5 = inlined_call_operand.vmem [shape: f32[4,1,8], index: 5, kind: input, shape index: {}]   ;;  %s3707_s6 = inlined_call_operand.vmem [shape: f32[4,1,8], index: 6, kind: input, shape index: {}]   ;;  %s3708_s7 = inlined_call_operand.vmem [shape: f32[4,1,8], index: 7, kind: input, shape index: {}]   ;;  %s3709_s8 = inlined_call_operand.vmem [shape: f32[1,32], index: 8, kind: input, shape index: {}]   ;;  %s3710_s9 = inlined_call_operand.hbm [shape: f32[2,8,32], index: 9, kind: output, shape index: {}]  }
   0x1   :  { %v38_v0 = vld [vmem:[%s3702_s1 + $0x18] sm:$0xff]  ;;  %v37_v2 = vld [vmem:[%s3702_s1 + $0x10] sm:$0xff]  ;;  %v36_v4 = vld [vmem:[%s3702_s1 + $0x8] sm:$0xff] }
   0x2   :  { %v131_v1 = vld [vmem:[%s3703_s2 + $0x18] sm:$0xff]  ;;  %2976 = vmatprep.subr.mxu0 %v38_v0  ;;  %v130_v3 = vld [vmem:[%s3703_s2 + $0x10] sm:$0xff]  ;;  %v129_v5 = vld [vmem:[%s3703_s2 + $0x8] sm:$0xff] }
   0x3   :  { %2987 = vmatprep.subr.mxu1 %v131_v1  ;;  %2977 = vmatpush3.msra.mxu0 %v38_v0 }
   0x4   :  { %2988 = vmatpush3.msra.mxu1 %v131_v1  ;;  %2978 = vmatprep.subr.mxu0 %v37_v2 }
   0x5   :  { %2989 = vmatprep.subr.mxu1 %v130_v3 }
   0x6   :  { %14 = vsyncpa [#allocation3], 0  ;;  %2979 = vmatpush3.msra.mxu0 %v37_v2  ;;  %2990 = vmatpush3.msra.mxu1 %v130_v3  ;;  %v35_v6 = vld [vmem:[%s3702_s1] sm:$0xff]  ;;  %vm46_vm0 = vcmask 261120   ;;  %v3354_v9 = vld [vmem:[%s3701_s0 + $0x8] sm:$0xff]  ;;  %v3267_v10 = vmov 0.0  }
   0x7   :  { %v128_v7 = vld [vmem:[%s3703_s2] sm:$0xff]  ;;  %2980 = vmatprep.subr.mxu0 %v36_v4  ;;  %2991 = vmatprep.subr.mxu1 %v129_v5  ;;  %vm3268_vm1 = vmmov 0   ;;  %v217_v11 = vld [vmem:[%s3704_s3 + $0x18] sm:$0xff]  ;;  %v216_v12 = vld [vmem:[%s3704_s3 + $0x10] sm:$0xff]  ;;  %vm302_vm2 = vcmask 64512   ;;  %s3269_s26 = smov [#allocation2]  }
   0x8   :  { %v3349_v8 = vld [vmem:[%s3701_s0] sm:$0xff]  ;;  %2981 = vmatpush3.msra.mxu0 %v36_v4  ;;  %2992 = vmatpush3.msra.mxu1 %v129_v5  ;;  %v215_v13 = vld [vmem:[%s3704_s3 + $0x8] sm:$0xff]  ;;  %v2769_v38 = vld [vmem:[%s3703_s2 + $0x38] sm:$0xff]  ;;  %s2732_s27 = sshll.u32 %s3269_s26, 4  ;;  %s2733_s27 = int_to_ptr.vmem [resolvable:$true] %s2732_s27 }
   0x9   :  { %2982 = vmatprep.subr.mxu0 %v35_v6  ;;  %2993 = vmatprep.subr.mxu1 %v128_v7  ;;  %v214_v14 = vld [vmem:[%s3704_s3] sm:$0xff]  ;;  %v2761_v39 = vld [vmem:[%s3702_s1 + $0x38] sm:$0xff]  ;;  %v2768_v47 = vld [vmem:[%s3703_s2 + $0x30] sm:$0xff]  ;;  %s3245_s28 = scalar_lea.vmem %s2733_s27, 256  ;;  %p3250_p1 = scmp.lt.s32.totalorder %s2733_s27, %s2733_s27 }
   0xa   :  { %2983 = vmatpush3.msra.mxu0 %v35_v6  ;;  %2984 = vmatprep.mubr.msk.f32.mxu0 %vm46_vm0, %v3349_v8  ;;  %v2743_v16 = vld [vmem:[%s3706_s5] ss:$0 sm:$0xff]  ;;  %v2767_v48 = vld [vmem:[%s3703_s2 + $0x28] sm:$0xff]  ;;  %v2760_v50 = vld [vmem:[%s3702_s1 + $0x30] sm:$0xff]  ;;  %p3246_p0 = scmp.ne.s32.totalorder %s2733_s27, %s3245_s28  ;;  %p3251_p2 = scmp.lt.s32.totalorder %s3245_s28, %s3245_s28 }
   0xb   :  { %2994 = vmatpush3.msra.mxu1 %v128_v7  ;;  %2995 = vmatprep.mubr.msk.f32.mxu1 %vm46_vm0, %v3349_v8  ;;  %v2746_v18 = vld [vmem:[%s3707_s6] ss:$0 sm:$0xff]  ;;  %v2759_v53 = vld [vmem:[%s3702_s1 + $0x28] sm:$0xff]  ;;  %v2777_v55 = vld [vmem:[%s3704_s3 + $0x38] sm:$0xff] }
   0xc   :  { %2985 = vmatmul.mubr.msk.f32.vlgmr.msra.gmra.mxu0 %vm46_vm0, %v3354_v9  ;;  %2996 = vmatmul.mubr.msk.f32.vlgmr.msra.gmra.mxu1 %vm46_vm0, %v3354_v9  ;;  %v2749_v34 = vld [vmem:[%s3708_s7] ss:$0 sm:$0xff]  ;;  %v2776_v56 = vld [vmem:[%s3704_s3 + $0x30] sm:$0xff]  ;;  %v2775_v57 = vld [vmem:[%s3704_s3 + $0x28] sm:$0xff]  ;;  %p3252_p3 = por %p3251_p2, %p3250_p1 }
   0xd   :  { %3006 = vmatprep.mubr.msk.f32.mxu0 %vm46_vm0, %v3349_v8  ;;  %3009 = vmatprep.subr.mxu1 %v3267_v10  ;;  %v2766_v52 = vld [vmem:[%s3703_s2 + $0x20] sm:$0xff] }
   0xe   :  { %3011 = vmatprep.mubr.msk.f32.mxu1 %vm3268_vm1, %v3267_v10  ;;  %2998 = vmatprep.subr.mxu0 %v217_v11  ;;  %v2758_v54 = vld [vmem:[%s3702_s1 + $0x20] sm:$0xff]  ;;  %p3253_p4 = pnand %p3252_p3, %p3246_p0 }
   0xf   :  { %2999 = vmatpush3.msra.mxu0 %v217_v11  ;;  %v2774_v58 = vld [vmem:[%s3704_s3 + $0x20] sm:$0xff] }
  0x10   :  { %3000 = vmatprep.subr.mxu0 %v216_v12  ;;  %v2771_v0 = vld [vmem:[%s3707_s6 + $0x1] ss:$0 sm:$0xff] }
  0x11   :  { %3001 = vmatpush3.msra.mxu0 %v216_v12  ;;  %v2763_v4 = vld [vmem:[%s3706_s5 + $0x1] ss:$0 sm:$0xff] }
  0x12   :  { %3002 = vmatprep.subr.mxu0 %v215_v13 }
  0x13   :  { %3003 = vmatpush3.msra.mxu0 %v215_v13 }
  0x14   :  { %3004 = vmatprep.subr.mxu0 %v214_v14 }
  0x15   :  { %3005 = vmatpush3.msra.mxu0 %v214_v14 }
  0x16   :  { %3007 = vmatmul.mubr.msk.f32.vlgmr.msra.gmra.mxu0 %vm46_vm0, %v3354_v9  ;;  %3019 = vmatprep.subr.mxu0 %v3267_v10 }
  0x17   :  { %3021 = vmatprep.mubr.msk.f32.mxu0 %vm3268_vm1, %v3267_v10 }
  0xcc   :  { %v2986_v15 = vpop.f32.mrf.mxu0  ;;  %v2997_v17 = vpop.f32.mrf.mxu1 }
  0xcd   :  { %v125_v24 = vadd.f32 %v2986_v15, %v2743_v16  ;;  %v211_v25 = vadd.f32 %v2997_v17, %v2746_v18 }
  0xce   :  { %v119_v19 = vpop.f32.mrf.mxu0  ;;  %v205_v20 = vpop.f32.mrf.mxu1 }
  0xcf   :  { %v120_v21 = vadd.f32 %v2743_v16, %v119_v19  ;;  %v206_v22 = vadd.f32 %v2746_v18, %v205_v20  ;;  %v301_v26 = vmul.f32 0.35355338, %v125_v24 }
  0xd1   :  { %v300_v23 = vmul.f32 0.35355338, %v120_v21  ;;  %3010 = vmatpush3.xpose.msk.msra.mxu1 %vm302_vm2, %v206_v22  ;;  %v2779_v22 = vld [vmem:[%s3708_s7 + $0x1] ss:$0 sm:$0xff] }
  0xd2   :  { %3014 = vmatprep.subr.mxu1 %v3267_v10 }
  0xd4   :  { %3012 = vmatmul.mubr.msk.f32.vlgmr.msra.gmra.mxu1 %vm302_vm2, %v300_v23 }
  0xd5   :  { %3015 = vmatpush3.xpose.msk.msra.mxu1 %vm302_vm2, %v211_v25  ;;  %3016 = vmatprep.mubr.msk.f32.mxu1 %vm3268_vm1, %v3267_v10 }
  0xd6   :  { %3024 = vmatprep.subr.mxu1 %v3267_v10  ;;  %v3008_v33 = vpop.f32.mrf.mxu0 }
  0xd7   :  { %v297_v35 = vadd.f32 %v3008_v33, %v2749_v34 }
  0xd8   :  { %3017 = vmatmul.mubr.msk.f32.vlgmr.msra.gmra.mxu1 %vm302_vm2, %v301_v26  ;;  %v291_v36 = vpop.f32.mrf.mxu0  ;;  %v623_v26 = vld [vmem:[%s3705_s4] sm:$0xff] }
  0xd9   :  { %3026 = vmatprep.mubr.msk.f32.mxu1 %vm3268_vm1, %v3267_v10  ;;  %v292_v37 = vadd.f32 %v2749_v34, %v291_v36  ;;  %3025 = vmatpush3.msra.mxu1 %v297_v35 }
  0xda   :  { %3040 = vmatprep.subr.mxu1 %v2769_v38 }
  0xdb   :  { %3020 = vmatpush3.msra.mxu0 %v292_v37 }
  0xdc   :  { %3029 = vmatprep.subr.mxu0 %v2761_v39 }
 0x194   :  { %v375_v27 = vpop.f32.mrf.mxu1 }
 0x195   :  { %v455_v32 = vsel %vm302_vm2, %v375_v27, -inf }
 0x196   :  { %v3013_v28 = vpop.f32.mrf.mxu1 }
 0x198   :  { %v451_v29 = vpop.f32.mrf.mxu1 }
 0x199   :  { %v458_v30 = vsel %vm302_vm2, %v451_v29, -inf }
 0x19a   :  { %459 = vmax.xlane.f32.xlu0 %v458_v30  ;;  %v3018_v31 = vpop.f32.mrf.mxu1 }
 0x19e   :  { %456 = vmax.xlane.f32.xlu0 %v455_v32 }
 0x223   :  { %v460_v40 = vpop.xlane.xlu0 %459 }
 0x224   :  { %v462_v41 = vsub.f32 %v451_v29, %v460_v40 }
 0x226   :  { %v465_v42 = vmul.f32 1.442695, %v462_v41 }
 0x227   :  { %v457_v43 = vpop.xlane.xlu0 %456 }
 0x228   :  { %3213 = vpow2.f32 %v465_v42  ;;  %v461_v44 = vsub.f32 %v375_v27, %v457_v43  ;;  %v2788_v43 = vld [vmem:[%s3705_s4 + $0x8] sm:$0xff] }
 0x22a   :  { %v463_v45 = vmul.f32 1.442695, %v461_v44  ;;  %v2804_v44 = vld [vmem:[%s3703_s2 + $0x58] sm:$0xff] }
 0x22c   :  { %3215 = vpow2.f32 %v463_v45  ;;  %v2803_v45 = vld [vmem:[%s3703_s2 + $0x50] sm:$0xff] }
 0x235   :  { %v3413_v46 = vpop.eup %3213 }
 0x236   :  { %3027 = vmatmul.mubr.msk.f32.vlgmr.msra.gmra.mxu1 %vm302_vm2, %v3413_v46  ;;  %v470_v20 = vsel %vm302_vm2, %v3413_v46, 0.0  ;;  %v2796_v46 = vld [vmem:[%s3702_s1 + $0x58] sm:$0xff] }
 0x237   :  { %3041 = vmatpush3.msra.mxu1 %v2769_v38  ;;  %3048 = vmatprep.mubr.msk.f32.mxu1 %vm46_vm0, %v3349_v8 }
 0x238   :  { %3042 = vmatprep.subr.mxu1 %v2768_v47 }
 0x239   :  { %v3216_v49 = vpop.eup %3215  ;;  %3043 = vmatpush3.msra.mxu1 %v2768_v47  ;;  %v2802_v47 = vld [vmem:[%s3703_s2 + $0x48] sm:$0xff] }
 0x23a   :  { %3022 = vmatmul.mubr.msk.f32.vlgmr.msra.gmra.mxu0 %vm302_vm2, %v3216_v49  ;;  %3044 = vmatprep.subr.mxu1 %v2767_v48  ;;  %v467_v51 = vsel %vm302_vm2, %v3216_v49, 0.0 }
 0x23b   :  { %3030 = vmatpush3.msra.mxu0 %v2761_v39  ;;  %3045 = vmatpush3.msra.mxu1 %v2767_v48  ;;  %v2801_v48 = vld [vmem:[%s3703_s2 + $0x40] sm:$0xff] }
 0x23c   :  { %3031 = vmatprep.subr.mxu0 %v2760_v50  ;;  %468 = vadd.xlane.f32.xlu0 %v467_v51 }
 0x23d   :  { %3032 = vmatpush3.msra.mxu0 %v2760_v50  ;;  %3046 = vmatprep.subr.mxu1 %v2766_v52 }
 0x23e   :  { %3033 = vmatprep.subr.mxu0 %v2759_v53  ;;  %3047 = vmatpush3.msra.mxu1 %v2766_v52 }
 0x23f   :  { %3034 = vmatpush3.msra.mxu0 %v2759_v53  ;;  %3049 = vmatmul.mubr.msk.f32.vlgmr.msra.gmra.mxu1 %vm46_vm0, %v3354_v9 }
 0x240   :  { %3035 = vmatprep.subr.mxu0 %v2758_v54  ;;  %3037 = vmatprep.mubr.msk.f32.mxu0 %vm46_vm0, %v3349_v8 }
 0x241   :  { %3036 = vmatpush3.msra.mxu0 %v2758_v54  ;;  %3062 = vmatprep.subr.mxu1 %v3267_v10 }
 0x242   :  { %3038 = vmatmul.mubr.msk.f32.vlgmr.msra.gmra.mxu0 %vm46_vm0, %v3354_v9  ;;  %3064 = vmatprep.mubr.msk.f32.mxu1 %vm3268_vm1, %v3267_v10 }
 0x243   :  { %3059 = vmatprep.mubr.msk.f32.mxu0 %vm46_vm0, %v3349_v8  ;;  %3051 = vmatprep.subr.mxu0 %v2777_v55 }
 0x244   :  { %3052 = vmatpush3.msra.mxu0 %v2777_v55 }
 0x245   :  { %3053 = vmatprep.subr.mxu0 %v2776_v56 }
 0x246   :  { %3054 = vmatpush3.msra.mxu0 %v2776_v56 }
 0x247   :  { %3055 = vmatprep.subr.mxu0 %v2775_v57 }
 0x248   :  { %3056 = vmatpush3.msra.mxu0 %v2775_v57 }
 0x249   :  { %3057 = vmatprep.subr.mxu0 %v2774_v58 }
 0x24a   :  { %3058 = vmatpush3.msra.mxu0 %v2774_v58 }
 0x24b   :  { %3060 = vmatmul.mubr.msk.f32.vlgmr.msra.gmra.mxu0 %vm46_vm0, %v3354_v9  ;;  %3072 = vmatprep.subr.mxu0 %v3267_v10 }
 0x24c   :  { %3074 = vmatprep.mubr.msk.f32.mxu0 %vm3268_vm1, %v3267_v10 }
 0x2c5   :  { %v469_v31 = vpop.xlane.xlu0 %468 }
 0x2f6   :  { %v3467_v59 = vpop.f32.mrf.mxu1 }
 0x2f8   :  { %v3028_v60 = vpop.f32.mrf.mxu1 }
 0x2f9   :  { %v2794_v60 = vld [vmem:[%s3702_s1 + $0x48] sm:$0xff] }
 0x2fa   :  { %v542_v61 = vpop.f32.mrf.mxu0 }
 0x2fc   :  { %v3023_v62 = vpop.f32.mrf.mxu0 }
 0x2ff   :  { %v3050_v63 = vpop.f32.mrf.mxu1 }
 0x300   :  { %v797_v12 = vadd.f32 %v3050_v63, %v2771_v0 }
 0x301   :  { %v791_v1 = vpop.f32.mrf.mxu1 }
 0x302   :  { %v792_v2 = vadd.f32 %v2771_v0, %v791_v1  ;;  %v3039_v3 = vpop.f32.mrf.mxu0  ;;  %v2806_v0 = vld [vmem:[%s3707_s6 + $0x2] ss:$0 sm:$0xff] }
 0x303   :  { %v709_v7 = vadd.f32 %v3039_v3, %v2763_v4 }
 0x304   :  { %v703_v5 = vpop.f32.mrf.mxu0  ;;  %3063 = vmatpush3.xpose.msk.msra.mxu1 %vm302_vm2, %v792_v2 }
 0x305   :  { %v704_v6 = vadd.f32 %v2763_v4, %v703_v5  ;;  %3067 = vmatprep.subr.mxu1 %v3267_v10  ;;  %v889_v13 = vmul.f32 0.35355338, %v709_v7  ;;  %v2812_v5 = vld [vmem:[%s3704_s3 + $0x58] sm:$0xff]  ;;  %v2810_v7 = vld [vmem:[%s3704_s3 + $0x48] sm:$0xff] }
 0x307   :  { %v888_v11 = vmul.f32 0.35355338, %v704_v6  ;;  %v2811_v6 = vld [vmem:[%s3704_s3 + $0x50] sm:$0xff] }
 0x309   :  { %3065 = vmatmul.mubr.msk.f32.vlgmr.msra.gmra.mxu1 %vm302_vm2, %v888_v11  ;;  %v2809_v11 = vld [vmem:[%s3704_s3 + $0x40] sm:$0xff] }
 0x30a   :  { %3068 = vmatpush3.xpose.msk.msra.mxu1 %vm302_vm2, %v797_v12  ;;  %3069 = vmatprep.mubr.msk.f32.mxu1 %vm3268_vm1, %v3267_v10 }
 0x30b   :  { %3077 = vmatprep.subr.mxu1 %v3267_v10  ;;  %v3061_v21 = vpop.f32.mrf.mxu0 }
 0x30c   :  { %v885_v23 = vadd.f32 %v3061_v21, %v2779_v22 }
 0x30d   :  { %3070 = vmatmul.mubr.msk.f32.vlgmr.msra.gmra.mxu1 %vm302_vm2, %v889_v13  ;;  %v879_v24 = vpop.f32.mrf.mxu0 }
 0x30e   :  { %3079 = vmatprep.mubr.msk.f32.mxu1 %vm3268_vm1, %v3267_v10  ;;  %v880_v25 = vadd.f32 %v2779_v22, %v879_v24  ;;  %3078 = vmatpush3.msra.mxu1 %v885_v23 }
 0x30f   :  { %3087 = vmatprep.subr.mxu1 %v623_v26 }
 0x310   :  { %3073 = vmatpush3.msra.mxu0 %v880_v25 }
 0x311   :  { %3082 = vmatprep.subr.mxu0 %v2788_v43 }
 0x3c9   :  { %v962_v14 = vpop.f32.mrf.mxu1 }
 0x3ca   :  { %v1042_v15 = vsel %vm302_vm2, %v962_v14, -inf }
 0x3cb   :  { %1043 = vmax.xlane.f32.xlu1 %v1042_v15  ;;  %v3066_v16 = vpop.f32.mrf.mxu1  ;;  %v2798_v15 = vld [vmem:[%s3706_s5 + $0x2] ss:$0 sm:$0xff] }
 0x3cd   :  { %v1038_v17 = vpop.f32.mrf.mxu1 }
 0x3ce   :  { %v1045_v18 = vsel %vm302_vm2, %v1038_v17, -inf }
 0x3cf   :  { %1046 = vmax.xlane.f32.xlu1 %v1045_v18  ;;  %v3071_v19 = vpop.f32.mrf.mxu1 }
 0x3d3   :  { %471 = vadd.xlane.f32.xlu1 %v470_v20 }
 0x454   :  { %v1044_v27 = vpop.xlane.xlu1 %1043 }
 0x455   :  { %v1048_v28 = vsub.f32 %v962_v14, %v1044_v27 }
 0x457   :  { %v1050_v29 = vmul.f32 1.442695, %v1048_v28  ;;  %v2814_v28 = vld [vmem:[%s3708_s7 + $0x2] ss:$0 sm:$0xff] }
 0x458   :  { %v1047_v30 = vpop.xlane.xlu1 %1046 }
 0x459   :  { %3217 = vpow2.f32 %v1050_v29  ;;  %v1049_v32 = vsub.f32 %v1038_v17, %v1047_v30 }
 0x45a   :  { %3219 = vrcp.f32 %v469_v31 }
 0x45b   :  { %v1052_v33 = vmul.f32 1.442695, %v1049_v32 }
 0x45c   :  { %v472_v34 = vpop.xlane.xlu1 %471 }
 0x45d   :  { %3221 = vpow2.f32 %v1052_v33 }
 0x45e   :  { %3223 = vrcp.f32 %v472_v34 }
 0x466   :  { %v3218_v35 = vpop.eup %3217 }
 0x467   :  { %3075 = vmatmul.mubr.msk.f32.vlgmr.msra.gmra.mxu0 %vm302_vm2, %v3218_v35  ;;  %v1054_v36 = vsel %vm302_vm2, %v3218_v35, 0.0  ;;  %v3220_v37 = vpop.eup %3219 }
 0x468   :  { %1055 = vadd.xlane.f32.xlu0 %v1054_v36  ;;  %v621_v39 = vmul.f32 %v3220_v37, %v542_v61  ;;  %3083 = vmatpush3.msra.mxu0 %v2788_v43  ;;  %v2793_v61 = vld [vmem:[%s3702_s1 + $0x40] sm:$0xff]  ;;  %v2829_v43 = vld [vmem:[%s3702_s1 + $0x78] sm:$0xff] }
 0x469   :  { %3092 = vmatprep.subr.mxu0 %v2796_v46 }
 0x46a   :  { %v3222_v38 = vpop.eup %3221 }
 0x46b   :  { %v3224_v40 = vpop.eup %3223  ;;  %3080 = vmatmul.mubr.msk.f32.vlgmr.msra.gmra.mxu1 %vm302_vm2, %v3222_v38  ;;  %v1057_v41 = vsel %vm302_vm2, %v3222_v38, 0.0 }
 0x46c   :  { %3089 = vmatprep.mubr.msk.f32.mxu1 %vm302_vm2, %v621_v39  ;;  %1058 = vadd.xlane.f32.xlu1 %v1057_v41  ;;  %v622_v42 = vmul.f32 %v3224_v40, %v3467_v59  ;;  %v2795_v59 = vld [vmem:[%s3702_s1 + $0x50] sm:$0xff] }
 0x46d   :  { %3088 = vmatpush3.msra.mxu1 %v623_v26 }
 0x46e   :  { %3103 = vmatprep.subr.mxu1 %v2804_v44 }
 0x46f   :  { %3090 = vmatmul.mubr.msk.f32.vlgmr.msra.gmra.mxu1 %vm302_vm2, %v622_v42  ;;  %v2823_v42 = vld [vmem:[%s3705_s4 + $0x10] sm:$0xff] }
 0x470   :  { %3111 = vmatprep.mubr.msk.f32.mxu1 %vm46_vm0, %v3349_v8  ;;  %3104 = vmatpush3.msra.mxu1 %v2804_v44  ;;  %v2837_v44 = vld [vmem:[%s3703_s2 + $0x78] sm:$0xff] }
 0x471   :  { %3105 = vmatprep.subr.mxu1 %v2803_v45 }
 0x472   :  { %3106 = vmatpush3.msra.mxu1 %v2803_v45  ;;  %v2828_v45 = vld [vmem:[%s3702_s1 + $0x70] sm:$0xff] }
 0x473   :  { %3107 = vmatprep.subr.mxu1 %v2802_v47 }
 0x474   :  { %3108 = vmatpush3.msra.mxu1 %v2802_v47  ;;  %v2826_v47 = vld [vmem:[%s3702_s1 + $0x60] sm:$0xff] }
 0x475   :  { %3109 = vmatprep.subr.mxu1 %v2801_v48 }
 0x476   :  { %3110 = vmatpush3.msra.mxu1 %v2801_v48 }
 0x477   :  { %3112 = vmatmul.mubr.msk.f32.vlgmr.msra.gmra.mxu1 %vm46_vm0, %v3354_v9  ;;  %3125 = vmatprep.subr.mxu1 %v3267_v10 }
 0x478   :  { %3127 = vmatprep.mubr.msk.f32.mxu1 %vm3268_vm1, %v3267_v10 }
 0x4f1   :  { %v1056_v49 = vpop.xlane.xlu0 %1055 }
 0x4f2   :  { %3225 = vrcp.f32 %v1056_v49 }
 0x4f5   :  { %v1059_v50 = vpop.xlane.xlu1 %1058 }
 0x4f6   :  { %3227 = vrcp.f32 %v1059_v50 }
 0x4ff   :  { %v3226_v51 = vpop.eup %3225 }
 0x503   :  { %v3228_v55 = vpop.eup %3227 }
 0x527   :  { %v1129_v52 = vpop.f32.mrf.mxu0 }
 0x528   :  { %v1208_v53 = vmul.f32 %v3226_v51, %v1129_v52 }
 0x529   :  { %v3076_v54 = vpop.f32.mrf.mxu0 }
 0x52a   :  { %3084 = vmatprep.mubr.msk.f32.mxu0 %vm302_vm2, %v1208_v53 }
 0x52b   :  { %v1202_v56 = vpop.f32.mrf.mxu1 }
 0x52c   :  { %v1209_v57 = vmul.f32 %v3228_v55, %v1202_v56 }
 0x52d   :  { %v3081_v58 = vpop.f32.mrf.mxu1 }
 0x52e   :  { %3085 = vmatmul.mubr.msk.f32.vlgmr.msra.gmra.mxu0 %vm302_vm2, %v1209_v57  ;;  %v2836_v58 = vld [vmem:[%s3703_s2 + $0x70] sm:$0xff] }
 0x52f   :  { %3093 = vmatpush3.msra.mxu0 %v2796_v46  ;;  %3100 = vmatprep.mubr.msk.f32.mxu0 %vm46_vm0, %v3349_v8  ;;  %v3544_v62 = vpop.f32.mrf.mxu1  ;;  %v2827_v46 = vld [vmem:[%s3702_s1 + $0x68] sm:$0xff] }
 0x530   :  { %3094 = vmatprep.subr.mxu0 %v2795_v59 }
 0x531   :  { %3095 = vmatpush3.msra.mxu0 %v2795_v59  ;;  %v3546_v63 = vpop.f32.mrf.mxu1  ;;  %v2835_v59 = vld [vmem:[%s3703_s2 + $0x68] sm:$0xff] }
 0x532   :  { %3096 = vmatprep.subr.mxu0 %v2794_v60 }
 0x533   :  { %3097 = vmatpush3.msra.mxu0 %v2794_v60  ;;  %v2834_v60 = vld [vmem:[%s3703_s2 + $0x60] sm:$0xff] }
 0x534   :  { %3098 = vmatprep.subr.mxu0 %v2793_v61 }
 0x535   :  { %3099 = vmatpush3.msra.mxu0 %v2793_v61  ;;  %v2844_v61 = vld [vmem:[%s3704_s3 + $0x70] sm:$0xff] }
 0x536   :  { %3101 = vmatmul.mubr.msk.f32.vlgmr.msra.gmra.mxu0 %vm46_vm0, %v3354_v9  ;;  %3114 = vmatprep.subr.mxu0 %v2812_v5 }
 0x537   :  { %3122 = vmatprep.mubr.msk.f32.mxu0 %vm46_vm0, %v3349_v8  ;;  %v3113_v1 = vpop.f32.mrf.mxu1  ;;  %3115 = vmatpush3.msra.mxu0 %v2812_v5 }
 0x538   :  { %v1547_v2 = vadd.f32 %v3113_v1, %v2806_v0  ;;  %3116 = vmatprep.subr.mxu0 %v2811_v6  ;;  %v2842_v1 = vld [vmem:[%s3704_s3 + $0x60] sm:$0xff] }
 0x539   :  { %v1541_v3 = vpop.f32.mrf.mxu1  ;;  %3117 = vmatpush3.msra.mxu0 %v2811_v6 }
 0x53a   :  { %v1542_v4 = vadd.f32 %v2806_v0, %v1541_v3  ;;  %3118 = vmatprep.subr.mxu0 %v2810_v7  ;;  %v2843_v0 = vld [vmem:[%s3704_s3 + $0x68] sm:$0xff] }
 0x53b   :  { %3119 = vmatpush3.msra.mxu0 %v2810_v7 }
 0x53c   :  { %3126 = vmatpush3.xpose.msk.msra.mxu1 %vm302_vm2, %v1542_v4  ;;  %3120 = vmatprep.subr.mxu0 %v2809_v11 }
 0x53d   :  { %3130 = vmatprep.subr.mxu1 %v3267_v10  ;;  %3121 = vmatpush3.msra.mxu0 %v2809_v11 }
 0x53e   :  { %3123 = vmatmul.mubr.msk.f32.vlgmr.msra.gmra.mxu0 %vm46_vm0, %v3354_v9  ;;  %3135 = vmatprep.subr.mxu0 %v3267_v10 }
 0x53f   :  { %3137 = vmatprep.mubr.msk.f32.mxu0 %vm3268_vm1, %v3267_v10 }
 0x5ee   :  { %v3570_v12 = vpop.f32.mrf.mxu0 }
 0x5f0   :  { %v3572_v13 = vpop.f32.mrf.mxu0 }
 0x5f1   :  { %v1366_v4 = vadd.f32 %v3546_v63, %v3572_v13 }
 0x5f6   :  { %v3102_v14 = vpop.f32.mrf.mxu0 }
 0x5f7   :  { %v1459_v18 = vadd.f32 %v3102_v14, %v2798_v15 }
 0x5f8   :  { %v1453_v16 = vpop.f32.mrf.mxu0 }
 0x5f9   :  { %v1454_v17 = vadd.f32 %v2798_v15, %v1453_v16  ;;  %v1639_v20 = vmul.f32 0.35355338, %v1459_v18 }
 0x5fb   :  { %v1638_v19 = vmul.f32 0.35355338, %v1454_v17 }
 0x5fd   :  { %3128 = vmatmul.mubr.msk.f32.vlgmr.msra.gmra.mxu1 %vm302_vm2, %v1638_v19 }
 0x5fe   :  { %3131 = vmatpush3.xpose.msk.msra.mxu1 %vm302_vm2, %v1547_v2  ;;  %3132 = vmatprep.mubr.msk.f32.mxu1 %vm3268_vm1, %v3267_v10  ;;  %v3124_v27 = vpop.f32.mrf.mxu0  ;;  %v1371_v2 = vadd.f32 %v3544_v62, %v3570_v12  ;;  %v2839_v62 = vld [vmem:[%s3707_s6 + $0x3] ss:$0 sm:$0xff] }
 0x5ff   :  { %3140 = vmatprep.subr.mxu1 %v3267_v10  ;;  %v1635_v29 = vadd.f32 %v3124_v27, %v2814_v28  ;;  %v2847_v27 = vld [vmem:[%s3708_s7 + $0x3] ss:$0 sm:$0xff] }
 0x600   :  { %v1629_v30 = vpop.f32.mrf.mxu0 }
 0x601   :  { %3133 = vmatmul.mubr.msk.f32.vlgmr.msra.gmra.mxu1 %vm302_vm2, %v1639_v20  ;;  %v1630_v31 = vadd.f32 %v2814_v28, %v1629_v30 }
 0x602   :  { %3142 = vmatprep.mubr.msk.f32.mxu1 %vm3268_vm1, %v3267_v10  ;;  %3141 = vmatpush3.msra.mxu1 %v1635_v29 }
 0x603   :  { %3136 = vmatpush3.msra.mxu0 %v1630_v31  ;;  %3150 = vmatprep.subr.mxu1 %v2829_v43 }
 0x604   :  { %3145 = vmatprep.subr.mxu0 %v2823_v42 }
 0x6bd   :  { %v1712_v21 = vpop.f32.mrf.mxu1 }
 0x6be   :  { %v1792_v22 = vsel %vm302_vm2, %v1712_v21, -inf }
 0x6bf   :  { %1793 = vmax.xlane.f32.xlu0 %v1792_v22  ;;  %v3129_v23 = vpop.f32.mrf.mxu1 }
 0x6c1   :  { %v1788_v24 = vpop.f32.mrf.mxu1 }
 0x6c2   :  { %v1795_v25 = vsel %vm302_vm2, %v1788_v24, -inf }
 0x6c3   :  { %1796 = vmax.xlane.f32.xlu1 %v1795_v25  ;;  %v3134_v26 = vpop.f32.mrf.mxu1 }
 0x748   :  { %v1794_v32 = vpop.xlane.xlu0 %1793 }
 0x749   :  { %v1798_v33 = vsub.f32 %v1712_v21, %v1794_v32 }
 0x74b   :  { %v1800_v34 = vmul.f32 1.442695, %v1798_v33 }
 0x74c   :  { %v1797_v35 = vpop.xlane.xlu1 %1796 }
 0x74d   :  { %3229 = vpow2.f32 %v1800_v34  ;;  %v1799_v36 = vsub.f32 %v1788_v24, %v1797_v35 }
 0x74f   :  { %v1802_v37 = vmul.f32 1.442695, %v1799_v36 }
 0x751   :  { %3231 = vpow2.f32 %v1802_v37 }
 0x75a   :  { %v3230_v38 = vpop.eup %3229 }
 0x75b   :  { %3138 = vmatmul.mubr.msk.f32.vlgmr.msra.gmra.mxu0 %vm302_vm2, %v3230_v38  ;;  %v1804_v39 = vsel %vm302_vm2, %v3230_v38, 0.0 }
 0x75c   :  { %1805 = vadd.xlane.f32.xlu0 %v1804_v39  ;;  %3146 = vmatpush3.msra.mxu0 %v2823_v42 }
 0x75d   :  { %3161 = vmatprep.subr.mxu0 %v2837_v44 }
 0x75e   :  { %v3232_v40 = vpop.eup %3231 }
 0x75f   :  { %3143 = vmatmul.mubr.msk.f32.vlgmr.msra.gmra.mxu1 %vm302_vm2, %v3232_v40  ;;  %v1807_v41 = vsel %vm302_vm2, %v3232_v40, 0.0  ;;  %v2856_v40 = vld [vmem:[%s3705_s4 + $0x18] sm:$0xff] }
 0x760   :  { %1808 = vadd.xlane.f32.xlu1 %v1807_v41  ;;  %3158 = vmatprep.mubr.msk.f32.mxu1 %vm46_vm0, %v3349_v8 }
 0x761   :  { %3151 = vmatpush3.msra.mxu1 %v2829_v43 }
 0x762   :  { %3152 = vmatprep.subr.mxu1 %v2828_v45 }
 0x763   :  { %3153 = vmatpush3.msra.mxu1 %v2828_v45 }
 0x764   :  { %3154 = vmatprep.subr.mxu1 %v2827_v46 }
 0x765   :  { %3155 = vmatpush3.msra.mxu1 %v2827_v46 }
 0x766   :  { %3156 = vmatprep.subr.mxu1 %v2826_v47 }
 0x767   :  { %3157 = vmatpush3.msra.mxu1 %v2826_v47 }
 0x768   :  { %3159 = vmatmul.mubr.msk.f32.vlgmr.msra.gmra.mxu1 %vm46_vm0, %v3354_v9 }
 0x769   :  { %3180 = vmatprep.mubr.msk.f32.mxu1 %vm46_vm0, %v3349_v8 }
 0x7e5   :  { %v1806_v48 = vpop.xlane.xlu0 %1805 }
 0x7e6   :  { %3233 = vrcp.f32 %v1806_v48 }
 0x7e9   :  { %v1809_v49 = vpop.xlane.xlu1 %1808 }
 0x7ea   :  { %3235 = vrcp.f32 %v1809_v49 }
 0x7f3   :  { %v3234_v50 = vpop.eup %3233 }
 0x7f7   :  { %v3236_v54 = vpop.eup %3235 }
 0x81b   :  { %v1879_v51 = vpop.f32.mrf.mxu0 }
 0x81c   :  { %v1958_v52 = vmul.f32 %v3234_v50, %v1879_v51 }
 0x81d   :  { %v3139_v53 = vpop.f32.mrf.mxu0 }
 0x81e   :  { %3147 = vmatprep.mubr.msk.f32.mxu0 %vm302_vm2, %v1958_v52  ;;  %v2859_v52 = vld [vmem:[%s3709_s8] ss:$0 sm:$0xff] }
 0x81f   :  { %v1952_v55 = vpop.f32.mrf.mxu1 }
 0x820   :  { %v1959_v56 = vmul.f32 %v3236_v54, %v1952_v55 }
 0x821   :  { %v3144_v57 = vpop.f32.mrf.mxu1 }
 0x822   :  { %3148 = vmatmul.mubr.msk.f32.vlgmr.msra.gmra.mxu0 %vm302_vm2, %v1959_v56 }
 0x823   :  { %3162 = vmatpush3.msra.mxu0 %v2837_v44  ;;  %3169 = vmatprep.mubr.msk.f32.mxu0 %vm46_vm0, %v3349_v8  ;;  %v2845_v8 = vld [vmem:[%s3704_s3 + $0x78] sm:$0xff] }
 0x824   :  { %3163 = vmatprep.subr.mxu0 %v2836_v58  ;;  %3172 = vmatprep.subr.mxu1 %v2845_v8 }
 0x825   :  { %3164 = vmatpush3.msra.mxu0 %v2836_v58  ;;  %3173 = vmatpush3.msra.mxu1 %v2845_v8 }
 0x826   :  { %3165 = vmatprep.subr.mxu0 %v2835_v59  ;;  %3174 = vmatprep.subr.mxu1 %v2844_v61 }
 0x827   :  { %3166 = vmatpush3.msra.mxu0 %v2835_v59  ;;  %3175 = vmatpush3.msra.mxu1 %v2844_v61 }
 0x828   :  { %3167 = vmatprep.subr.mxu0 %v2834_v60  ;;  %3176 = vmatprep.subr.mxu1 %v2843_v0  ;;  %v3160_v11 = vpop.f32.mrf.mxu1 }
 0x829   :  { %3168 = vmatpush3.msra.mxu0 %v2834_v60  ;;  %3177 = vmatpush3.msra.mxu1 %v2843_v0 }
 0x82a   :  { %3170 = vmatmul.mubr.msk.f32.vlgmr.msra.gmra.mxu0 %vm46_vm0, %v3354_v9  ;;  %3183 = vmatprep.subr.mxu0 %v3267_v10  ;;  %v2124_v14 = vpop.f32.mrf.mxu1 }
 0x82b   :  { %3185 = vmatprep.mubr.msk.f32.mxu0 %vm3268_vm1, %v3267_v10  ;;  %3178 = vmatprep.subr.mxu1 %v2842_v1 }
 0x82c   :  { %3179 = vmatpush3.msra.mxu1 %v2842_v1 }
 0x82d   :  { %3181 = vmatmul.mubr.msk.f32.vlgmr.msra.gmra.mxu1 %vm46_vm0, %v3354_v9  ;;  %3193 = vmatprep.subr.mxu1 %v3267_v10  ;;  %v2831_v9 = vld [vmem:[%s3706_s5 + $0x3] ss:$0 sm:$0xff] }
 0x82e   :  { %3195 = vmatprep.mubr.msk.f32.mxu1 %vm3268_vm1, %v3267_v10  ;;  %v2125_v12 = vadd.f32 %v2831_v9, %v2124_v14  ;;  %v2130_v63 = vadd.f32 %v3160_v11, %v2831_v9 }
 0x830   :  { %v2309_v13 = vmul.f32 0.35355338, %v2125_v12  ;;  %v2310_v19 = vmul.f32 0.35355338, %v2130_v63 }
 0x8e2   :  { %v3149_v3 = vpop.f32.mrf.mxu0 }
 0x8e3   :  { %v3657_v5 = vadd.f32 %v3149_v3, %v1371_v2 }
 0x8e4   :  { %v2034_v6 = vpop.f32.mrf.mxu0 }
 0x8e5   :  { %v3659_v7 = vadd.f32 %v2034_v6, %v1366_v4 }
 0x8ea   :  { %v3171_v15 = vpop.f32.mrf.mxu0 }
 0x8eb   :  { %v2218_v18 = vadd.f32 %v3171_v15, %v2839_v62 }
 0x8ec   :  { %v2212_v16 = vpop.f32.mrf.mxu0 }
 0x8ed   :  { %v2213_v17 = vadd.f32 %v2839_v62, %v2212_v16  ;;  %v3182_v26 = vpop.f32.mrf.mxu1 }
 0x8ee   :  { %v2306_v28 = vadd.f32 %v3182_v26, %v2847_v27 }
 0x8ef   :  { %3184 = vmatpush3.xpose.msk.msra.mxu0 %vm302_vm2, %v2213_v17  ;;  %v2300_v29 = vpop.f32.mrf.mxu1 }
 0x8f0   :  { %3188 = vmatprep.subr.mxu0 %v3267_v10  ;;  %v2301_v30 = vadd.f32 %v2847_v27, %v2300_v29 }
 0x8f2   :  { %3186 = vmatmul.mubr.msk.f32.vlgmr.msra.gmra.mxu0 %vm302_vm2, %v2309_v13  ;;  %3194 = vmatpush3.msra.mxu1 %v2301_v30 }
 0x8f3   :  { %3189 = vmatpush3.xpose.msk.msra.mxu0 %vm302_vm2, %v2218_v18  ;;  %3190 = vmatprep.mubr.msk.f32.mxu0 %vm3268_vm1, %v3267_v10 }
 0x8f4   :  { %3198 = vmatprep.subr.mxu0 %v3267_v10  ;;  %3203 = vmatprep.subr.mxu1 %v2856_v40 }
 0x8f6   :  { %3191 = vmatmul.mubr.msk.f32.vlgmr.msra.gmra.mxu0 %vm302_vm2, %v2310_v19 }
 0x8f7   :  { %3200 = vmatprep.mubr.msk.f32.mxu0 %vm3268_vm1, %v3267_v10  ;;  %3199 = vmatpush3.msra.mxu0 %v2306_v28 }
 0x9b2   :  { %v2383_v20 = vpop.f32.mrf.mxu0 }
 0x9b3   :  { %v2463_v21 = vsel %vm302_vm2, %v2383_v20, -inf }
 0x9b4   :  { %2464 = vmax.xlane.f32.xlu0 %v2463_v21  ;;  %v3187_v22 = vpop.f32.mrf.mxu0 }
 0x9b6   :  { %v2459_v23 = vpop.f32.mrf.mxu0 }
 0x9b7   :  { %v2466_v24 = vsel %vm302_vm2, %v2459_v23, -inf }
 0x9b8   :  { %2467 = vmax.xlane.f32.xlu1 %v2466_v24  ;;  %v3192_v25 = vpop.f32.mrf.mxu0 }
 0xa3d   :  { %v2465_v10 = vpop.xlane.xlu0 %2464 }
 0xa3e   :  { %v2469_v31 = vsub.f32 %v2383_v20, %v2465_v10 }
 0xa40   :  { %v2471_v32 = vmul.f32 1.442695, %v2469_v31 }
 0xa41   :  { %v2468_v33 = vpop.xlane.xlu1 %2467 }
 0xa42   :  { %3237 = vpow2.f32 %v2471_v32  ;;  %v2470_v34 = vsub.f32 %v2459_v23, %v2468_v33 }
 0xa44   :  { %v2473_v35 = vmul.f32 1.442695, %v2470_v34 }
 0xa46   :  { %3239 = vpow2.f32 %v2473_v35 }
 0xa4f   :  { %v3238_v36 = vpop.eup %3237 }
 0xa50   :  { %3196 = vmatmul.mubr.msk.f32.vlgmr.msra.gmra.mxu1 %vm302_vm2, %v3238_v36  ;;  %v2475_v37 = vsel %vm302_vm2, %v3238_v36, 0.0 }
 0xa51   :  { %2476 = vadd.xlane.f32.xlu0 %v2475_v37  ;;  %3204 = vmatpush3.msra.mxu1 %v2856_v40 }
 0xa53   :  { %v3240_v38 = vpop.eup %3239 }
 0xa54   :  { %3201 = vmatmul.mubr.msk.f32.vlgmr.msra.gmra.mxu0 %vm302_vm2, %v3240_v38  ;;  %v2478_v39 = vsel %vm302_vm2, %v3240_v38, 0.0 }
 0xa55   :  { %2479 = vadd.xlane.f32.xlu1 %v2478_v39 }
 0xada   :  { %v2477_v41 = vpop.xlane.xlu0 %2476 }
 0xadb   :  { %3241 = vrcp.f32 %v2477_v41 }
 0xade   :  { %v2480_v42 = vpop.xlane.xlu1 %2479 }
 0xadf   :  { %3243 = vrcp.f32 %v2480_v42 }
 0xae8   :  { %v3242_v43 = vpop.eup %3241 }
 0xaec   :  { %v3244_v47 = vpop.eup %3243 }
 0xb10   :  { %v2550_v44 = vpop.f32.mrf.mxu1 }
 0xb11   :  { %v2629_v45 = vmul.f32 %v3242_v43, %v2550_v44 }
 0xb12   :  { %v3197_v46 = vpop.f32.mrf.mxu1 }
 0xb13   :  { %3205 = vmatprep.mubr.msk.f32.mxu1 %vm302_vm2, %v2629_v45 }
 0xb14   :  { %v2623_v48 = vpop.f32.mrf.mxu0 }
 0xb15   :  { %v2630_v49 = vmul.f32 %v3244_v47, %v2623_v48 }
 0xb16   :  { %v3202_v50 = vpop.f32.mrf.mxu0 }
 0xb17   :  { %3206 = vmatmul.mubr.msk.f32.vlgmr.msra.gmra.mxu1 %vm302_vm2, %v2630_v49 }
 0xbd7   :  { %v3207_v51 = vpop.f32.mrf.mxu1 }
 0xbd8   :  { %v2715_v53 = vadd.f32 %v3207_v51, %v3657_v5 }
 0xbd9   :  { %v2705_v54 = vpop.f32.mrf.mxu1 }
 0xbda   :  { %v2724_v55 = vadd.f32 %v2859_v52, %v2715_v53  ;;  %v2714_v56 = vadd.f32 %v2705_v54, %v3659_v7 }
 0xbdc   :  { %2726 = vst.msk [vmem:[#allocation2 + $0x8] sm:$0xff] %vm46_vm0, %v2724_v55  ;;  %v2723_v57 = vadd.f32 %v2859_v52, %v2714_v56 }
 0xbde   :  { %2725 = vst.msk [vmem:[#allocation2] sm:$0xff] %vm46_vm0, %v2723_v57 }
 0xbdf   :  { %3256 = shalt.err (!%p3253_p4)
}
 0xbe0   :  { %s3270_s8 = smov 128   ;;  %s3271_s0 = smov 8  }
 0xbe1   :  { %2738 = dma.vmem_to_hbm [thread:$0]  %s2733_s27, 256, %s3710_s9, [#allocation3], %s3270_s8, %s3270_s8, %s3271_s0  }
 0xbe2   :  { %3265 = dma.done.wait [#allocation3], 256  }
 0xbe3   :  { %3266 = vsyncadd [#allocation3], 4294967040 }
 0xbe4   :  { %2742 = vsyncpa [#allocation3], 1 }

</bundles_post_ra>
